<compile_context>
chip_gen: v7x
topology: tpu7x:2x2x1
jax: 0.10.0
libtpu: 0.0.40
codegen_flags: <defaults>
</compile_context>

<pallas_src>
import jax
import jax.numpy as jnp
from jax.experimental import pallas as pl
from jax.experimental.pallas import tpu as pltpu

HIDDEN = 20            # hidden width of Net
SUBLANES = 8           # f32 sublane count per vreg / (8,128) tile
MAX_LANE_TILE = 2048   # cap lane-tile so live set (~3 blocks) fits in vregs


def mlp_kernel(params_ref, x_ref, o_ref):
    """VPU-only forward: y = relu(x*w1 + b1) @ w2 + b2, samples on (sublane, lane).

    params_ref: (61,) f32 in SMEM, packed [w1(20) | b1(20) | w2(20) | b2(1)]
    x_ref:      (8, lane_tile) f32 in VMEM
    o_ref:      (8, lane_tile) f32 in VMEM
    """
    x = x_ref[...]                                       # (8, lane_tile)
    acc = jnp.full_like(x, params_ref[3 * HIDDEN])       # init with b2
    # Hidden dim is tiny -> fully unrolled scalar-broadcast FMAs on the VPU.
    for j in range(HIDDEN):
        w1j = params_ref[j]                              # SMEM scalar loads
        b1j = params_ref[HIDDEN + j]
        w2j = params_ref[2 * HIDDEN + j]
        h = jnp.maximum(x * w1j + b1j, 0.0)              # relu(hidden_j)
        acc = acc + h * w2j                              # accumulate predict matvec
    o_ref[...] = acc


def net_forward(x, w1, b1, w2, b2):
    """x: (N, 1) f32. Weights stored as (in, out). Returns (N, 1) f32."""
    n = x.shape[0]

    # Pick a lane tile and pad N so the (8, lanes) slab tiles evenly.
    small_pad = SUBLANES * 128
    n_pad = -(-n // small_pad) * small_pad
    lanes = n_pad // SUBLANES
    if lanes <= MAX_LANE_TILE:
        lane_tile = lanes                                # single block, grid=(1,)
    else:
        lane_tile = MAX_LANE_TILE
        big_pad = SUBLANES * MAX_LANE_TILE
        n_pad = -(-n // big_pad) * big_pad
        lanes = n_pad // SUBLANES
    grid = (lanes // lane_tile,)

    # Sublane- and lane-dense slab: pad the flat batch, reshape to (8, lanes).
    xt = jnp.pad(x[:, 0].astype(jnp.float32), (0, n_pad - n)).reshape(SUBLANES, lanes)

    # Pack all 61 weight/bias scalars into one SMEM-prefetched vector.
    params = jnp.concatenate(
        [w1.reshape(-1), b1.reshape(-1), w2.reshape(-1), b2.reshape(-1)]
    ).astype(jnp.float32)

    yt = pl.pallas_call(
        mlp_kernel,
        out_shape=jax.ShapeDtypeStruct((SUBLANES, lanes), jnp.float32),
        grid_spec=pltpu.PrefetchScalarGridSpec(
            num_scalar_prefetch=1,
            grid=grid,
            in_specs=[pl.BlockSpec((SUBLANES, lane_tile), lambda i, params: (0, i))],
            out_specs=pl.BlockSpec((SUBLANES, lane_tile), lambda i, params: (0, i)),
        ),
        compiler_params=pltpu.CompilerParams(
            # Only worth splitting across TCs when each step has real work.
            dimension_semantics=("parallel",) if grid[0] > 1 else ("arbitrary",),
        ),
    )(params, xt)

    # Padded tail lanes hold relu(b1)*w2 + b2 garbage; slice them off here.
    return yt.reshape(-1)[:n].reshape(n, 1)


def init_params(key, in_dim=1, hidden_dim=HIDDEN, out_dim=1):
    """Deterministic init mimicking torch.nn.Linear's U(-1/sqrt(fan_in), ...)."""
    k1, k2, k3, k4 = jax.random.split(key, 4)
    bound1 = 1.0 / jnp.sqrt(jnp.float32(in_dim))
    bound2 = 1.0 / jnp.sqrt(jnp.float32(hidden_dim))
    # Stored as (in, out) so the math is x @ W (PyTorch stores (out, in)).
    w1 = jax.random.uniform(k1, (in_dim, hidden_dim), jnp.float32, -bound1, bound1)
    b1 = jax.random.uniform(k2, (1, hidden_dim), jnp.float32, -bound1, bound1)
    w2 = jax.random.uniform(k3, (hidden_dim, out_dim), jnp.float32, -bound2, bound2)
    b2 = jax.random.uniform(k4, (1, out_dim), jnp.float32, -bound2, bound2)
    return w1, b1, w2, b2


if __name__ == "__main__":
    key = jax.random.PRNGKey(0)

    # Matches the module: x = torch.unsqueeze(torch.linspace(-1, 1, 1000), dim=1)
    N = 1000
    x = jnp.linspace(-1.0, 1.0, N, dtype=jnp.float32).reshape(N, 1)

    w1, b1, w2, b2 = init_params(key)

    out = jax.block_until_ready(net_forward(x, w1, b1, w2, b2))

    # Pure-JAX reference of the same forward pass.
    ref = jnp.maximum(x @ w1 + b1, 0.0) @ w2 + b2
    assert out.shape == (N, 1)
    assert jnp.allclose(out, ref, atol=1e-5, rtol=1e-5)

    print("KERNEL_OK")
</pallas_src>

<mosaic_0001>
module attributes {stable_mosaic.version = 11 : i64} {
  func.func @mlp_kernel(%arg0: i32, %arg1: memref<61xf32, #tpu.memory_space<smem>>, %arg2: memref<8x128xf32, #tpu.memory_space<vmem>>, %arg3: memref<8x128xf32, #tpu.memory_space<vmem>>) attributes {dimension_semantics = [#tpu.dimension_semantics<arbitrary>], iteration_bounds = array<i64: 1>, scalar_prefetch = 1 : i64, scratch_operands = 0 : i64, tpu.core_type = #tpu.core_type<tc>, window_params = [{transform_indices = @transform_0, window_bounds = array<i64: 8, 128>}, {transform_indices = @transform_1, window_bounds = array<i64: 8, 128>}]} {
    %c0 = arith.constant 0 : index
    %c0_0 = arith.constant 0 : index
    %0 = vector.load %arg2[%c0, %c0_0] : memref<8x128xf32, #tpu.memory_space<vmem>>, vector<8x128xf32>
    %c60 = arith.constant 60 : index
    %1 = memref.load %arg1[%c60] : memref<61xf32, #tpu.memory_space<smem>>
    %2 = vector.broadcast %1 : f32 to vector<8x128xf32>
    %c0_1 = arith.constant 0 : index
    %3 = memref.load %arg1[%c0_1] : memref<61xf32, #tpu.memory_space<smem>>
    %c20 = arith.constant 20 : index
    %4 = memref.load %arg1[%c20] : memref<61xf32, #tpu.memory_space<smem>>
    %c40 = arith.constant 40 : index
    %5 = memref.load %arg1[%c40] : memref<61xf32, #tpu.memory_space<smem>>
    %6 = vector.broadcast %3 : f32 to vector<8x128xf32>
    %7 = arith.mulf %0, %6 : vector<8x128xf32>
    %8 = vector.broadcast %4 : f32 to vector<8x128xf32>
    %9 = arith.addf %7, %8 : vector<8x128xf32>
    %cst = arith.constant 0.000000e+00 : f32
    %10 = vector.broadcast %cst : f32 to vector<8x128xf32>
    %11 = arith.maximumf %9, %10 : vector<8x128xf32>
    %12 = vector.broadcast %5 : f32 to vector<8x128xf32>
    %13 = arith.mulf %11, %12 : vector<8x128xf32>
    %14 = arith.addf %2, %13 : vector<8x128xf32>
    %c1 = arith.constant 1 : index
    %15 = memref.load %arg1[%c1] : memref<61xf32, #tpu.memory_space<smem>>
    %c21 = arith.constant 21 : index
    %16 = memref.load %arg1[%c21] : memref<61xf32, #tpu.memory_space<smem>>
    %c41 = arith.constant 41 : index
    %17 = memref.load %arg1[%c41] : memref<61xf32, #tpu.memory_space<smem>>
    %18 = vector.broadcast %15 : f32 to vector<8x128xf32>
    %19 = arith.mulf %0, %18 : vector<8x128xf32>
    %20 = vector.broadcast %16 : f32 to vector<8x128xf32>
    %21 = arith.addf %19, %20 : vector<8x128xf32>
    %cst_2 = arith.constant 0.000000e+00 : f32
    %22 = vector.broadcast %cst_2 : f32 to vector<8x128xf32>
    %23 = arith.maximumf %21, %22 : vector<8x128xf32>
    %24 = vector.broadcast %17 : f32 to vector<8x128xf32>
    %25 = arith.mulf %23, %24 : vector<8x128xf32>
    %26 = arith.addf %14, %25 : vector<8x128xf32>
    %c2 = arith.constant 2 : index
    %27 = memref.load %arg1[%c2] : memref<61xf32, #tpu.memory_space<smem>>
    %c22 = arith.constant 22 : index
    %28 = memref.load %arg1[%c22] : memref<61xf32, #tpu.memory_space<smem>>
    %c42 = arith.constant 42 : index
    %29 = memref.load %arg1[%c42] : memref<61xf32, #tpu.memory_space<smem>>
    %30 = vector.broadcast %27 : f32 to vector<8x128xf32>
    %31 = arith.mulf %0, %30 : vector<8x128xf32>
    %32 = vector.broadcast %28 : f32 to vector<8x128xf32>
    %33 = arith.addf %31, %32 : vector<8x128xf32>
    %cst_3 = arith.constant 0.000000e+00 : f32
    %34 = vector.broadcast %cst_3 : f32 to vector<8x128xf32>
    %35 = arith.maximumf %33, %34 : vector<8x128xf32>
    %36 = vector.broadcast %29 : f32 to vector<8x128xf32>
    %37 = arith.mulf %35, %36 : vector<8x128xf32>
    %38 = arith.addf %26, %37 : vector<8x128xf32>
    %c3 = arith.constant 3 : index
    %39 = memref.load %arg1[%c3] : memref<61xf32, #tpu.memory_space<smem>>
    %c23 = arith.constant 23 : index
    %40 = memref.load %arg1[%c23] : memref<61xf32, #tpu.memory_space<smem>>
    %c43 = arith.constant 43 : index
    %41 = memref.load %arg1[%c43] : memref<61xf32, #tpu.memory_space<smem>>
    %42 = vector.broadcast %39 : f32 to vector<8x128xf32>
    %43 = arith.mulf %0, %42 : vector<8x128xf32>
    %44 = vector.broadcast %40 : f32 to vector<8x128xf32>
    %45 = arith.addf %43, %44 : vector<8x128xf32>
    %cst_4 = arith.constant 0.000000e+00 : f32
    %46 = vector.broadcast %cst_4 : f32 to vector<8x128xf32>
    %47 = arith.maximumf %45, %46 : vector<8x128xf32>
    %48 = vector.broadcast %41 : f32 to vector<8x128xf32>
    %49 = arith.mulf %47, %48 : vector<8x128xf32>
    %50 = arith.addf %38, %49 : vector<8x128xf32>
    %c4 = arith.constant 4 : index
    %51 = memref.load %arg1[%c4] : memref<61xf32, #tpu.memory_space<smem>>
    %c24 = arith.constant 24 : index
    %52 = memref.load %arg1[%c24] : memref<61xf32, #tpu.memory_space<smem>>
    %c44 = arith.constant 44 : index
    %53 = memref.load %arg1[%c44] : memref<61xf32, #tpu.memory_space<smem>>
    %54 = vector.broadcast %51 : f32 to vector<8x128xf32>
    %55 = arith.mulf %0, %54 : vector<8x128xf32>
    %56 = vector.broadcast %52 : f32 to vector<8x128xf32>
    %57 = arith.addf %55, %56 : vector<8x128xf32>
    %cst_5 = arith.constant 0.000000e+00 : f32
    %58 = vector.broadcast %cst_5 : f32 to vector<8x128xf32>
    %59 = arith.maximumf %57, %58 : vector<8x128xf32>
    %60 = vector.broadcast %53 : f32 to vector<8x128xf32>
    %61 = arith.mulf %59, %60 : vector<8x128xf32>
    %62 = arith.addf %50, %61 : vector<8x128xf32>
    %c5 = arith.constant 5 : index
    %63 = memref.load %arg1[%c5] : memref<61xf32, #tpu.memory_space<smem>>
    %c25 = arith.constant 25 : index
    %64 = memref.load %arg1[%c25] : memref<61xf32, #tpu.memory_space<smem>>
    %c45 = arith.constant 45 : index
    %65 = memref.load %arg1[%c45] : memref<61xf32, #tpu.memory_space<smem>>
    %66 = vector.broadcast %63 : f32 to vector<8x128xf32>
    %67 = arith.mulf %0, %66 : vector<8x128xf32>
    %68 = vector.broadcast %64 : f32 to vector<8x128xf32>
    %69 = arith.addf %67, %68 : vector<8x128xf32>
    %cst_6 = arith.constant 0.000000e+00 : f32
    %70 = vector.broadcast %cst_6 : f32 to vector<8x128xf32>
    %71 = arith.maximumf %69, %70 : vector<8x128xf32>
    %72 = vector.broadcast %65 : f32 to vector<8x128xf32>
    %73 = arith.mulf %71, %72 : vector<8x128xf32>
    %74 = arith.addf %62, %73 : vector<8x128xf32>
    %c6 = arith.constant 6 : index
    %75 = memref.load %arg1[%c6] : memref<61xf32, #tpu.memory_space<smem>>
    %c26 = arith.constant 26 : index
    %76 = memref.load %arg1[%c26] : memref<61xf32, #tpu.memory_space<smem>>
    %c46 = arith.constant 46 : index
    %77 = memref.load %arg1[%c46] : memref<61xf32, #tpu.memory_space<smem>>
    %78 = vector.broadcast %75 : f32 to vector<8x128xf32>
    %79 = arith.mulf %0, %78 : vector<8x128xf32>
    %80 = vector.broadcast %76 : f32 to vector<8x128xf32>
    %81 = arith.addf %79, %80 : vector<8x128xf32>
    %cst_7 = arith.constant 0.000000e+00 : f32
    %82 = vector.broadcast %cst_7 : f32 to vector<8x128xf32>
    %83 = arith.maximumf %81, %82 : vector<8x128xf32>
    %84 = vector.broadcast %77 : f32 to vector<8x128xf32>
    %85 = arith.mulf %83, %84 : vector<8x128xf32>
    %86 = arith.addf %74, %85 : vector<8x128xf32>
    %c7 = arith.constant 7 : index
    %87 = memref.load %arg1[%c7] : memref<61xf32, #tpu.memory_space<smem>>
    %c27 = arith.constant 27 : index
    %88 = memref.load %arg1[%c27] : memref<61xf32, #tpu.memory_space<smem>>
    %c47 = arith.constant 47 : index
    %89 = memref.load %arg1[%c47] : memref<61xf32, #tpu.memory_space<smem>>
    %90 = vector.broadcast %87 : f32 to vector<8x128xf32>
    %91 = arith.mulf %0, %90 : vector<8x128xf32>
    %92 = vector.broadcast %88 : f32 to vector<8x128xf32>
    %93 = arith.addf %91, %92 : vector<8x128xf32>
    %cst_8 = arith.constant 0.000000e+00 : f32
    %94 = vector.broadcast %cst_8 : f32 to vector<8x128xf32>
    %95 = arith.maximumf %93, %94 : vector<8x128xf32>
    %96 = vector.broadcast %89 : f32 to vector<8x128xf32>
    %97 = arith.mulf %95, %96 : vector<8x128xf32>
    %98 = arith.addf %86, %97 : vector<8x128xf32>
    %c8 = arith.constant 8 : index
    %99 = memref.load %arg1[%c8] : memref<61xf32, #tpu.memory_space<smem>>
    %c28 = arith.constant 28 : index
    %100 = memref.load %arg1[%c28] : memref<61xf32, #tpu.memory_space<smem>>
    %c48 = arith.constant 48 : index
    %101 = memref.load %arg1[%c48] : memref<61xf32, #tpu.memory_space<smem>>
    %102 = vector.broadcast %99 : f32 to vector<8x128xf32>
    %103 = arith.mulf %0, %102 : vector<8x128xf32>
    %104 = vector.broadcast %100 : f32 to vector<8x128xf32>
    %105 = arith.addf %103, %104 : vector<8x128xf32>
    %cst_9 = arith.constant 0.000000e+00 : f32
    %106 = vector.broadcast %cst_9 : f32 to vector<8x128xf32>
    %107 = arith.maximumf %105, %106 : vector<8x128xf32>
    %108 = vector.broadcast %101 : f32 to vector<8x128xf32>
    %109 = arith.mulf %107, %108 : vector<8x128xf32>
    %110 = arith.addf %98, %109 : vector<8x128xf32>
    %c9 = arith.constant 9 : index
    %111 = memref.load %arg1[%c9] : memref<61xf32, #tpu.memory_space<smem>>
    %c29 = arith.constant 29 : index
    %112 = memref.load %arg1[%c29] : memref<61xf32, #tpu.memory_space<smem>>
    %c49 = arith.constant 49 : index
    %113 = memref.load %arg1[%c49] : memref<61xf32, #tpu.memory_space<smem>>
    %114 = vector.broadcast %111 : f32 to vector<8x128xf32>
    %115 = arith.mulf %0, %114 : vector<8x128xf32>
    %116 = vector.broadcast %112 : f32 to vector<8x128xf32>
    %117 = arith.addf %115, %116 : vector<8x128xf32>
    %cst_10 = arith.constant 0.000000e+00 : f32
    %118 = vector.broadcast %cst_10 : f32 to vector<8x128xf32>
    %119 = arith.maximumf %117, %118 : vector<8x128xf32>
    %120 = vector.broadcast %113 : f32 to vector<8x128xf32>
    %121 = arith.mulf %119, %120 : vector<8x128xf32>
    %122 = arith.addf %110, %121 : vector<8x128xf32>
    %c10 = arith.constant 10 : index
    %123 = memref.load %arg1[%c10] : memref<61xf32, #tpu.memory_space<smem>>
    %c30 = arith.constant 30 : index
    %124 = memref.load %arg1[%c30] : memref<61xf32, #tpu.memory_space<smem>>
    %c50 = arith.constant 50 : index
    %125 = memref.load %arg1[%c50] : memref<61xf32, #tpu.memory_space<smem>>
    %126 = vector.broadcast %123 : f32 to vector<8x128xf32>
    %127 = arith.mulf %0, %126 : vector<8x128xf32>
    %128 = vector.broadcast %124 : f32 to vector<8x128xf32>
    %129 = arith.addf %127, %128 : vector<8x128xf32>
    %cst_11 = arith.constant 0.000000e+00 : f32
    %130 = vector.broadcast %cst_11 : f32 to vector<8x128xf32>
    %131 = arith.maximumf %129, %130 : vector<8x128xf32>
    %132 = vector.broadcast %125 : f32 to vector<8x128xf32>
    %133 = arith.mulf %131, %132 : vector<8x128xf32>
    %134 = arith.addf %122, %133 : vector<8x128xf32>
    %c11 = arith.constant 11 : index
    %135 = memref.load %arg1[%c11] : memref<61xf32, #tpu.memory_space<smem>>
    %c31 = arith.constant 31 : index
    %136 = memref.load %arg1[%c31] : memref<61xf32, #tpu.memory_space<smem>>
    %c51 = arith.constant 51 : index
    %137 = memref.load %arg1[%c51] : memref<61xf32, #tpu.memory_space<smem>>
    %138 = vector.broadcast %135 : f32 to vector<8x128xf32>
    %139 = arith.mulf %0, %138 : vector<8x128xf32>
    %140 = vector.broadcast %136 : f32 to vector<8x128xf32>
    %141 = arith.addf %139, %140 : vector<8x128xf32>
    %cst_12 = arith.constant 0.000000e+00 : f32
    %142 = vector.broadcast %cst_12 : f32 to vector<8x128xf32>
    %143 = arith.maximumf %141, %142 : vector<8x128xf32>
    %144 = vector.broadcast %137 : f32 to vector<8x128xf32>
    %145 = arith.mulf %143, %144 : vector<8x128xf32>
    %146 = arith.addf %134, %145 : vector<8x128xf32>
    %c12 = arith.constant 12 : index
    %147 = memref.load %arg1[%c12] : memref<61xf32, #tpu.memory_space<smem>>
    %c32 = arith.constant 32 : index
    %148 = memref.load %arg1[%c32] : memref<61xf32, #tpu.memory_space<smem>>
    %c52 = arith.constant 52 : index
    %149 = memref.load %arg1[%c52] : memref<61xf32, #tpu.memory_space<smem>>
    %150 = vector.broadcast %147 : f32 to vector<8x128xf32>
    %151 = arith.mulf %0, %150 : vector<8x128xf32>
    %152 = vector.broadcast %148 : f32 to vector<8x128xf32>
    %153 = arith.addf %151, %152 : vector<8x128xf32>
    %cst_13 = arith.constant 0.000000e+00 : f32
    %154 = vector.broadcast %cst_13 : f32 to vector<8x128xf32>
    %155 = arith.maximumf %153, %154 : vector<8x128xf32>
    %156 = vector.broadcast %149 : f32 to vector<8x128xf32>
    %157 = arith.mulf %155, %156 : vector<8x128xf32>
    %158 = arith.addf %146, %157 : vector<8x128xf32>
    %c13 = arith.constant 13 : index
    %159 = memref.load %arg1[%c13] : memref<61xf32, #tpu.memory_space<smem>>
    %c33 = arith.constant 33 : index
    %160 = memref.load %arg1[%c33] : memref<61xf32, #tpu.memory_space<smem>>
    %c53 = arith.constant 53 : index
    %161 = memref.load %arg1[%c53] : memref<61xf32, #tpu.memory_space<smem>>
    %162 = vector.broadcast %159 : f32 to vector<8x128xf32>
    %163 = arith.mulf %0, %162 : vector<8x128xf32>
    %164 = vector.broadcast %160 : f32 to vector<8x128xf32>
    %165 = arith.addf %163, %164 : vector<8x128xf32>
    %cst_14 = arith.constant 0.000000e+00 : f32
    %166 = vector.broadcast %cst_14 : f32 to vector<8x128xf32>
    %167 = arith.maximumf %165, %166 : vector<8x128xf32>
    %168 = vector.broadcast %161 : f32 to vector<8x128xf32>
    %169 = arith.mulf %167, %168 : vector<8x128xf32>
    %170 = arith.addf %158, %169 : vector<8x128xf32>
    %c14 = arith.constant 14 : index
    %171 = memref.load %arg1[%c14] : memref<61xf32, #tpu.memory_space<smem>>
    %c34 = arith.constant 34 : index
    %172 = memref.load %arg1[%c34] : memref<61xf32, #tpu.memory_space<smem>>
    %c54 = arith.constant 54 : index
    %173 = memref.load %arg1[%c54] : memref<61xf32, #tpu.memory_space<smem>>
    %174 = vector.broadcast %171 : f32 to vector<8x128xf32>
    %175 = arith.mulf %0, %174 : vector<8x128xf32>
    %176 = vector.broadcast %172 : f32 to vector<8x128xf32>
    %177 = arith.addf %175, %176 : vector<8x128xf32>
    %cst_15 = arith.constant 0.000000e+00 : f32
    %178 = vector.broadcast %cst_15 : f32 to vector<8x128xf32>
    %179 = arith.maximumf %177, %178 : vector<8x128xf32>
    %180 = vector.broadcast %173 : f32 to vector<8x128xf32>
    %181 = arith.mulf %179, %180 : vector<8x128xf32>
    %182 = arith.addf %170, %181 : vector<8x128xf32>
    %c15 = arith.constant 15 : index
    %183 = memref.load %arg1[%c15] : memref<61xf32, #tpu.memory_space<smem>>
    %c35 = arith.constant 35 : index
    %184 = memref.load %arg1[%c35] : memref<61xf32, #tpu.memory_space<smem>>
    %c55 = arith.constant 55 : index
    %185 = memref.load %arg1[%c55] : memref<61xf32, #tpu.memory_space<smem>>
    %186 = vector.broadcast %183 : f32 to vector<8x128xf32>
    %187 = arith.mulf %0, %186 : vector<8x128xf32>
    %188 = vector.broadcast %184 : f32 to vector<8x128xf32>
    %189 = arith.addf %187, %188 : vector<8x128xf32>
    %cst_16 = arith.constant 0.000000e+00 : f32
    %190 = vector.broadcast %cst_16 : f32 to vector<8x128xf32>
    %191 = arith.maximumf %189, %190 : vector<8x128xf32>
    %192 = vector.broadcast %185 : f32 to vector<8x128xf32>
    %193 = arith.mulf %191, %192 : vector<8x128xf32>
    %194 = arith.addf %182, %193 : vector<8x128xf32>
    %c16 = arith.constant 16 : index
    %195 = memref.load %arg1[%c16] : memref<61xf32, #tpu.memory_space<smem>>
    %c36 = arith.constant 36 : index
    %196 = memref.load %arg1[%c36] : memref<61xf32, #tpu.memory_space<smem>>
    %c56 = arith.constant 56 : index
    %197 = memref.load %arg1[%c56] : memref<61xf32, #tpu.memory_space<smem>>
    %198 = vector.broadcast %195 : f32 to vector<8x128xf32>
    %199 = arith.mulf %0, %198 : vector<8x128xf32>
    %200 = vector.broadcast %196 : f32 to vector<8x128xf32>
    %201 = arith.addf %199, %200 : vector<8x128xf32>
    %cst_17 = arith.constant 0.000000e+00 : f32
    %202 = vector.broadcast %cst_17 : f32 to vector<8x128xf32>
    %203 = arith.maximumf %201, %202 : vector<8x128xf32>
    %204 = vector.broadcast %197 : f32 to vector<8x128xf32>
    %205 = arith.mulf %203, %204 : vector<8x128xf32>
    %206 = arith.addf %194, %205 : vector<8x128xf32>
    %c17 = arith.constant 17 : index
    %207 = memref.load %arg1[%c17] : memref<61xf32, #tpu.memory_space<smem>>
    %c37 = arith.constant 37 : index
    %208 = memref.load %arg1[%c37] : memref<61xf32, #tpu.memory_space<smem>>
    %c57 = arith.constant 57 : index
    %209 = memref.load %arg1[%c57] : memref<61xf32, #tpu.memory_space<smem>>
    %210 = vector.broadcast %207 : f32 to vector<8x128xf32>
    %211 = arith.mulf %0, %210 : vector<8x128xf32>
    %212 = vector.broadcast %208 : f32 to vector<8x128xf32>
    %213 = arith.addf %211, %212 : vector<8x128xf32>
    %cst_18 = arith.constant 0.000000e+00 : f32
    %214 = vector.broadcast %cst_18 : f32 to vector<8x128xf32>
    %215 = arith.maximumf %213, %214 : vector<8x128xf32>
    %216 = vector.broadcast %209 : f32 to vector<8x128xf32>
    %217 = arith.mulf %215, %216 : vector<8x128xf32>
    %218 = arith.addf %206, %217 : vector<8x128xf32>
    %c18 = arith.constant 18 : index
    %219 = memref.load %arg1[%c18] : memref<61xf32, #tpu.memory_space<smem>>
    %c38 = arith.constant 38 : index
    %220 = memref.load %arg1[%c38] : memref<61xf32, #tpu.memory_space<smem>>
    %c58 = arith.constant 58 : index
    %221 = memref.load %arg1[%c58] : memref<61xf32, #tpu.memory_space<smem>>
    %222 = vector.broadcast %219 : f32 to vector<8x128xf32>
    %223 = arith.mulf %0, %222 : vector<8x128xf32>
    %224 = vector.broadcast %220 : f32 to vector<8x128xf32>
    %225 = arith.addf %223, %224 : vector<8x128xf32>
    %cst_19 = arith.constant 0.000000e+00 : f32
    %226 = vector.broadcast %cst_19 : f32 to vector<8x128xf32>
    %227 = arith.maximumf %225, %226 : vector<8x128xf32>
    %228 = vector.broadcast %221 : f32 to vector<8x128xf32>
    %229 = arith.mulf %227, %228 : vector<8x128xf32>
    %230 = arith.addf %218, %229 : vector<8x128xf32>
    %c19 = arith.constant 19 : index
    %231 = memref.load %arg1[%c19] : memref<61xf32, #tpu.memory_space<smem>>
    %c39 = arith.constant 39 : index
    %232 = memref.load %arg1[%c39] : memref<61xf32, #tpu.memory_space<smem>>
    %c59 = arith.constant 59 : index
    %233 = memref.load %arg1[%c59] : memref<61xf32, #tpu.memory_space<smem>>
    %234 = vector.broadcast %231 : f32 to vector<8x128xf32>
    %235 = arith.mulf %0, %234 : vector<8x128xf32>
    %236 = vector.broadcast %232 : f32 to vector<8x128xf32>
    %237 = arith.addf %235, %236 : vector<8x128xf32>
    %cst_20 = arith.constant 0.000000e+00 : f32
    %238 = vector.broadcast %cst_20 : f32 to vector<8x128xf32>
    %239 = arith.maximumf %237, %238 : vector<8x128xf32>
    %240 = vector.broadcast %233 : f32 to vector<8x128xf32>
    %241 = arith.mulf %239, %240 : vector<8x128xf32>
    %242 = arith.addf %230, %241 : vector<8x128xf32>
    %c0_21 = arith.constant 0 : index
    %c0_22 = arith.constant 0 : index
    %243 = vector.load %arg3[%c0_21, %c0_22] : memref<8x128xf32, #tpu.memory_space<vmem>>, vector<8x128xf32>
    tpu.vector_store %arg3[%c0_21, %c0_22], %242 {strides = array<i32>} : memref<8x128xf32, #tpu.memory_space<vmem>>, vector<8x128xf32>,
    return
  }
  func.func @transform_0(%arg0: i32, %arg1: memref<61xf32, #tpu.memory_space<smem>>) -> (i32, i32) {
    %c0_i32 = arith.constant 0 : i32
    %c0_i32_0 = arith.constant 0 : i32
    return %c0_i32, %arg0 : i32, i32
  }
  func.func @transform_1(%arg0: i32, %arg1: memref<61xf32, #tpu.memory_space<smem>>) -> (i32, i32) {
    %c0_i32 = arith.constant 0 : i32
    %c0_i32_0 = arith.constant 0 : i32
    return %c0_i32, %arg0 : i32, i32
  }
}

</mosaic_0001>

<bundles_post_ra>
// kernel: tpu_custom_call.1
= control target key start
LH: loop header
LB: loop body
LE: loop exit
PB: predicated region body
PF: predicated region fallthrough
CT: control target
= control target key end

     0   :  { %s635_s0 = inlined_call_operand.hbm [shape: f32[61], index: 0, kind: input, shape index: {}]   ;;  %s636_s1 = inlined_call_operand.hbm [shape: f32[8,128], index: 1, kind: input, shape index: {}]   ;;  %s637_s2 = inlined_call_operand.hbm [shape: f32[8,128], index: 2, kind: output, shape index: {}]  }
   0x1   :  { %s328_s11 = scalar_lea.hbm %s635_s0, 16 }
   0x2   :  { %p329_p0 = scmp.ne.s32.totalorder %s635_s0, %s328_s11  ;;  %p332_p1 = scmp.lt.u32.totalorder %s328_s11, %s635_s0 }
   0x4   :  { %p334_p2 = pnand %p332_p1, %p329_p0 }
   0x6   :  { %337 = shalt.err (!%p334_p2)  }
   0x7   :  { %s388_s16 = smov [#allocation3]  }
   0x8   :  { %8 = dma.hbm_to_smem %s635_s0, 16, %s388_s16, [#allocation2] }
   0x9   :  { %382 = dma.done.wait [#allocation2], 16 }
   0xa   :  { %383 = vsyncadd [#allocation2], 4294967280 }
   0xb   :  { %10 = sfence }
   0xc   :  { %11 = vsyncpa [#allocation5], 0 }
   0xd   :  { %12 = vsyncpa [#allocation6], 0  ;;  %s389_s19 = smov [#allocation4]   ;;  %s338_s23 = scalar_lea.hbm %s636_s1, 128 }
   0xe   :  { %s19_s20 = sshll.u32 %s389_s19, 4  ;;  %p339_p3 = scmp.ne.s32.totalorder %s636_s1, %s338_s23  ;;  %s20_s20 = int_to_ptr.vmem [resolvable:$true] %s19_s20 }
   0xf   :  { %p342_p4 = scmp.lt.u32.totalorder %s338_s23, %s636_s1 }
  0x11   :  { %p344_p5 = pnand %p342_p4, %p339_p3 }
  0x13   :  { %347 = shalt.err (!%p344_p5)
}
  0x14   :  { %s348_s0 = scalar_lea.vmem %s20_s20, 128  ;;  %p353_p7 = scmp.lt.s32.totalorder %s20_s20, %s20_s20 }
  0x15   :  { %p349_p6 = scmp.ne.s32.totalorder %s20_s20, %s348_s0  ;;  %p354_p8 = scmp.lt.s32.totalorder %s348_s0, %s348_s0 }
  0x17   :  { %p355_p9 = por %p354_p8, %p353_p7 }
  0x19   :  { %p356_p10 = pnand %p355_p9, %p349_p6 }
  0x1b   :  { %359 = shalt.err (!%p356_p10)
}
  0x1c   :  { %22 = dma.hbm_to_vmem [thread:$0]  %s636_s1, 128, %s20_s20, [#allocation5]  }
  0x1d   :  { %384 = dma.done.wait [#allocation5], 128  }
  0x1e   :  { %385 = vsyncadd [#allocation5], 4294967168  ;;  %s430_s30 = sld [smem:[#allocation3 + $0x3c]]  ;;  %s29_s3 = sld [smem:[#allocation3]]  ;;  %v446_v0 = vld [vmem:[#allocation4] sm:$0xff] }
  0x1f   :  { %s266_s4 = sld [smem:[#allocation3 + $0x14]]  ;;  %s432_s5 = sld [smem:[#allocation3 + $0x28]] }
  0x20   :  { %s268_s6 = sld [smem:[#allocation3 + $0x1]]  ;;  %s434_s7 = sld [smem:[#allocation3 + $0x15]] }
  0x21   :  { %s436_s8 = sld [smem:[#allocation3 + $0x29]]  ;;  %s271_s9 = sld [smem:[#allocation3 + $0x2]] }
  0x22   :  { %s438_s10 = sld [smem:[#allocation3 + $0x16]]  ;;  %s440_s11 = sld [smem:[#allocation3 + $0x2a]] }
  0x23   :  { %s442_s1 = sld [smem:[#allocation3 + $0x3]]  ;;  %s444_s12 = sld [smem:[#allocation3 + $0x17]] }
  0x24   :  { %v32_v1 = vstv %s29_s3  ;;  %s448_s13 = sld [smem:[#allocation3 + $0x2b]]  ;;  %s450_s14 = sld [smem:[#allocation3 + $0x4]]  ;;  %v28_v6 = vstv %s430_s30 }
  0x25   :  { %v33_v2 = vmul.f32 %v32_v1, %v446_v0  ;;  %v34_v3 = vstv %s266_s4  ;;  %s453_s15 = sld [smem:[#allocation3 + $0x18]]  ;;  %s455_s16 = sld [smem:[#allocation3 + $0x2c]]  ;;  %v37_v10 = vstv %s432_s5 }
  0x26   :  { %v43_v4 = vstv %s268_s6  ;;  %v45_v5 = vstv %s434_s7  ;;  %s458_s17 = sld [smem:[#allocation3 + $0x5]]  ;;  %s460_s18 = sld [smem:[#allocation3 + $0x19]] }
  0x27   :  { %v35_v7 = vadd.f32 %v34_v3, %v33_v2  ;;  %v44_v8 = vmul.f32 %v43_v4, %v446_v0  ;;  %v54_v9 = vstv %s271_s9  ;;  %s464_s19 = sld [smem:[#allocation3 + $0x6]]  ;;  %v48_v11 = vstv %s436_s8  ;;  %s470_s20 = sld [smem:[#allocation3 + $0x2d]] }
  0x28   :  { %v55_v12 = vmul.f32 %v54_v9, %v446_v0  ;;  %v56_v13 = vstv %s438_s10  ;;  %s472_s21 = sld [smem:[#allocation3 + $0x1a]]  ;;  %s476_s22 = sld [smem:[#allocation3 + $0x7]]  ;;  %v59_v19 = vstv %s440_s11 }
  0x29   :  { %v36_v14 = vmax.f32 %v35_v7, 0.0  ;;  %v46_v15 = vadd.f32 %v45_v5, %v44_v8  ;;  %v65_v16 = vstv %s442_s1  ;;  %v67_v17 = vstv %s444_s12  ;;  %s481_s23 = sld [smem:[#allocation3 + $0x2e]]  ;;  %s483_s24 = sld [smem:[#allocation3 + $0x1b]] }
  0x2a   :  { %v57_v18 = vadd.f32 %v56_v13, %v55_v12  ;;  %v66_v20 = vmul.f32 %v65_v16, %v446_v0  ;;  %v76_v21 = vstv %s450_s14  ;;  %s487_s25 = sld [smem:[#allocation3 + $0x8]]  ;;  %s489_s26 = sld [smem:[#allocation3 + $0x1c]]  ;;  %v70_v28 = vstv %s448_s13 }
  0x2b   :  { %v38_v22 = vmul.f32 %v37_v10, %v36_v14  ;;  %v47_v23 = vmax.f32 %v46_v15, 0.0  ;;  %v77_v24 = vmul.f32 %v76_v21, %v446_v0  ;;  %v78_v25 = vstv %s453_s15  ;;  %s493_s27 = sld [smem:[#allocation3 + $0x2f]]  ;;  %s496_s0 = sld [smem:[#allocation3 + $0x9]] }
  0x2c   :  { %v58_v26 = vmax.f32 %v57_v18, 0.0  ;;  %v68_v27 = vadd.f32 %v67_v17, %v66_v20  ;;  %v87_v29 = vstv %s458_s17  ;;  %s498_s28 = sld [smem:[#allocation3 + $0x1d]]  ;;  %v81_v36 = vstv %s455_s16  ;;  %s502_s29 = sld [smem:[#allocation3 + $0x30]] }
  0x2d   :  { %v39_v30 = vadd.f32 %v38_v22, %v28_v6  ;;  %v49_v31 = vmul.f32 %v48_v11, %v47_v23  ;;  %v79_v32 = vadd.f32 %v78_v25, %v77_v24  ;;  %v88_v33 = vmul.f32 %v87_v29, %v446_v0  ;;  %s505_s30 = sld [smem:[#allocation3 + $0xa]]  ;;  %s507_s3 = sld [smem:[#allocation3 + $0x1e]] }
  0x2e   :  { %v60_v34 = vmul.f32 %v59_v19, %v58_v26  ;;  %v69_v35 = vmax.f32 %v68_v27, 0.0  ;;  %v89_v37 = vstv %s460_s18  ;;  %v98_v41 = vstv %s464_s19  ;;  %s512_s4 = sld [smem:[#allocation3 + $0x31]]  ;;  %s515_s5 = sld [smem:[#allocation3 + $0xb]] }
  0x2f   :  { %v50_v38 = vadd.f32 %v49_v31, %v39_v30  ;;  %v80_v39 = vmax.f32 %v79_v32, 0.0  ;;  %v90_v40 = vadd.f32 %v89_v37, %v88_v33  ;;  %v92_v43 = vstv %s470_s20  ;;  %s517_s6 = sld [smem:[#allocation3 + $0x1f]]  ;;  %s522_s7 = sld [smem:[#allocation3 + $0x32]] }
  0x30   :  { %v71_v42 = vmul.f32 %v70_v28, %v69_v35  ;;  %v99_v44 = vmul.f32 %v98_v41, %v446_v0  ;;  %v100_v45 = vstv %s472_s21  ;;  %v109_v49 = vstv %s476_s22  ;;  %s526_s8 = sld [smem:[#allocation3 + $0xc]]  ;;  %s528_s9 = sld [smem:[#allocation3 + $0x20]] }
  0x31   :  { %v61_v46 = vadd.f32 %v60_v34, %v50_v38  ;;  %v82_v47 = vmul.f32 %v81_v36, %v80_v39  ;;  %v91_v48 = vmax.f32 %v90_v40, 0.0  ;;  %v103_v51 = vstv %s481_s23  ;;  %s531_s10 = sld [smem:[#allocation3 + $0x33]]  ;;  %s536_s11 = sld [smem:[#allocation3 + $0xd]] }
  0x32   :  { %v101_v50 = vadd.f32 %v100_v45, %v99_v44  ;;  %v110_v52 = vmul.f32 %v109_v49, %v446_v0  ;;  %v111_v53 = vstv %s483_s24  ;;  %v120_v56 = vstv %s487_s25  ;;  %s538_s1 = sld [smem:[#allocation3 + $0x21]]  ;;  %s541_s12 = sld [smem:[#allocation3 + $0x34]] }
  0x33   :  { %v72_v54 = vadd.f32 %v71_v42, %v61_v46  ;;  %v93_v55 = vmul.f32 %v92_v43, %v91_v48  ;;  %v122_v57 = vstv %s489_s26  ;;  %v121_v60 = vmul.f32 %v120_v56, %v446_v0  ;;  %s546_s13 = sld [smem:[#allocation3 + $0xe]]  ;;  %s548_s14 = sld [smem:[#allocation3 + $0x22]] }
  0x34   :  { %v102_v58 = vmax.f32 %v101_v50, 0.0  ;;  %v112_v59 = vadd.f32 %v111_v53, %v110_v52  ;;  %v114_v62 = vstv %s493_s27  ;;  %v131_v63 = vstv %s496_s0  ;;  %s551_s15 = sld [smem:[#allocation3 + $0x35]]  ;;  %s556_s16 = sld [smem:[#allocation3 + $0xf]] }
  0x35   :  { %v83_v61 = vadd.f32 %v82_v47, %v72_v54  ;;  %v133_v1 = vstv %s498_s28  ;;  %v123_v4 = vadd.f32 %v122_v57, %v121_v60  ;;  %v132_v5 = vmul.f32 %v131_v63, %v446_v0  ;;  %s558_s17 = sld [smem:[#allocation3 + $0x23]]  ;;  %s561_s18 = sld [smem:[#allocation3 + $0x36]] }
  0x36   :  { %v104_v2 = vmul.f32 %v103_v51, %v102_v58  ;;  %v113_v3 = vmax.f32 %v112_v59, 0.0  ;;  %v125_v7 = vstv %s502_s29  ;;  %v142_v8 = vstv %s505_s30  ;;  %s566_s19 = sld [smem:[#allocation3 + $0x10]]  ;;  %s568_s20 = sld [smem:[#allocation3 + $0x24]] }
  0x37   :  { %v94_v6 = vadd.f32 %v93_v55, %v83_v61  ;;  %v144_v9 = vstv %s507_s3  ;;  %v124_v11 = vmax.f32 %v123_v4, 0.0  ;;  %v134_v12 = vadd.f32 %v133_v1, %v132_v5  ;;  %s571_s21 = sld [smem:[#allocation3 + $0x37]]  ;;  %s576_s22 = sld [smem:[#allocation3 + $0x11]] }
  0x38   :  { %v115_v10 = vmul.f32 %v114_v62, %v113_v3  ;;  %v143_v13 = vmul.f32 %v142_v8, %v446_v0  ;;  %v136_v15 = vstv %s512_s4  ;;  %v153_v16 = vstv %s515_s5  ;;  %s578_s23 = sld [smem:[#allocation3 + $0x25]]  ;;  %s581_s24 = sld [smem:[#allocation3 + $0x38]] }
  0x39   :  { %v105_v14 = vadd.f32 %v104_v2, %v94_v6  ;;  %v155_v17 = vstv %s517_s6  ;;  %v126_v18 = vmul.f32 %v125_v7, %v124_v11  ;;  %v135_v19 = vmax.f32 %v134_v12, 0.0  ;;  %s586_s25 = sld [smem:[#allocation3 + $0x12]]  ;;  %s588_s26 = sld [smem:[#allocation3 + $0x26]] }
  0x3a   :  { %v145_v20 = vadd.f32 %v144_v9, %v143_v13  ;;  %v154_v21 = vmul.f32 %v153_v16, %v446_v0  ;;  %v147_v23 = vstv %s522_s7  ;;  %v164_v24 = vstv %s526_s8  ;;  %s591_s27 = sld [smem:[#allocation3 + $0x39]]  ;;  %s596_s0 = sld [smem:[#allocation3 + $0x13]] }
  0x3b   :  { %v116_v22 = vadd.f32 %v115_v10, %v105_v14  ;;  %v166_v25 = vstv %s528_s9  ;;  %v137_v26 = vmul.f32 %v136_v15, %v135_v19  ;;  %v165_v29 = vmul.f32 %v164_v24, %v446_v0  ;;  %s598_s28 = sld [smem:[#allocation3 + $0x27]]  ;;  %s604_s29 = sld [smem:[#allocation3 + $0x3a]] }
  0x3c   :  { %v146_v27 = vmax.f32 %v145_v20, 0.0  ;;  %v156_v28 = vadd.f32 %v155_v17, %v154_v21  ;;  %v158_v31 = vstv %s531_s10  ;;  %v175_v32 = vstv %s536_s11  ;;  %s610_s30 = sld [smem:[#allocation3 + $0x3b]]  ;;  %s390_s3 = smov [#allocation7]  }
  0x3d   :  { %v127_v30 = vadd.f32 %v126_v18, %v116_v22  ;;  %v177_v33 = vstv %s538_s1  ;;  %v167_v36 = vadd.f32 %v166_v25, %v165_v29  ;;  %v176_v37 = vmul.f32 %v175_v32, %v446_v0  ;;  %s256_s4 = sshll.u32 %s390_s3, 4  ;;  %s257_s4 = int_to_ptr.vmem [resolvable:$true] %s256_s4 }
  0x3e   :  { %v148_v34 = vmul.f32 %v147_v23, %v146_v27  ;;  %v157_v35 = vmax.f32 %v156_v28, 0.0  ;;  %v169_v39 = vstv %s541_s12  ;;  %v186_v40 = vstv %s546_s13  ;;  %s360_s5 = scalar_lea.vmem %s257_s4, 128  ;;  %p365_p12 = scmp.lt.s32.totalorder %s257_s4, %s257_s4 }
  0x3f   :  { %v138_v38 = vadd.f32 %v137_v26, %v127_v30  ;;  %v188_v41 = vstv %s548_s14  ;;  %v168_v43 = vmax.f32 %v167_v36, 0.0  ;;  %v178_v44 = vadd.f32 %v177_v33, %v176_v37  ;;  %p361_p11 = scmp.ne.s32.totalorder %s257_s4, %s360_s5  ;;  %p366_p13 = scmp.lt.s32.totalorder %s360_s5, %s360_s5 }
  0x40   :  { %v159_v42 = vmul.f32 %v158_v31, %v157_v35  ;;  %v187_v45 = vmul.f32 %v186_v40, %v446_v0  ;;  %v180_v47 = vstv %s551_s15  ;;  %v197_v48 = vstv %s556_s16 }
  0x41   :  { %v149_v46 = vadd.f32 %v148_v34, %v138_v38  ;;  %v199_v49 = vstv %s558_s17  ;;  %v170_v50 = vmul.f32 %v169_v39, %v168_v43  ;;  %v179_v51 = vmax.f32 %v178_v44, 0.0  ;;  %p367_p0 = por %p366_p13, %p365_p12 }
  0x42   :  { %v189_v52 = vadd.f32 %v188_v41, %v187_v45  ;;  %v198_v53 = vmul.f32 %v197_v48, %v446_v0  ;;  %v191_v55 = vstv %s561_s18  ;;  %v208_v56 = vstv %s566_s19 }
  0x43   :  { %v160_v54 = vadd.f32 %v159_v42, %v149_v46  ;;  %v210_v57 = vstv %s568_s20  ;;  %v181_v58 = vmul.f32 %v180_v47, %v179_v51  ;;  %v209_v61 = vmul.f32 %v208_v56, %v446_v0  ;;  %p368_p1 = pnand %p367_p0, %p361_p11 }
  0x44   :  { %v190_v59 = vmax.f32 %v189_v52, 0.0  ;;  %v200_v60 = vadd.f32 %v199_v49, %v198_v53  ;;  %v202_v63 = vstv %s571_s21  ;;  %v219_v1 = vstv %s576_s22 }
  0x45   :  { %v171_v62 = vadd.f32 %v170_v50, %v160_v54  ;;  %v221_v2 = vstv %s578_s23  ;;  %v211_v5 = vadd.f32 %v210_v57, %v209_v61  ;;  %v220_v6 = vmul.f32 %v219_v1, %v446_v0 }
  0x46   :  { %v192_v3 = vmul.f32 %v191_v55, %v190_v59  ;;  %v201_v4 = vmax.f32 %v200_v60, 0.0  ;;  %v213_v8 = vstv %s581_s24  ;;  %v230_v9 = vstv %s586_s25 }
  0x47   :  { %v182_v7 = vadd.f32 %v181_v58, %v171_v62  ;;  %v232_v10 = vstv %s588_s26  ;;  %v212_v12 = vmax.f32 %v211_v5, 0.0  ;;  %v222_v13 = vadd.f32 %v221_v2, %v220_v6 }
  0x48   :  { %v203_v11 = vmul.f32 %v202_v63, %v201_v4  ;;  %v231_v14 = vmul.f32 %v230_v9, %v446_v0  ;;  %v224_v16 = vstv %s591_s27  ;;  %v241_v17 = vstv %s596_s0 }
  0x49   :  { %v193_v15 = vadd.f32 %v192_v3, %v182_v7  ;;  %v243_v18 = vstv %s598_s28  ;;  %v214_v19 = vmul.f32 %v213_v8, %v212_v12  ;;  %v223_v20 = vmax.f32 %v222_v13, 0.0 }
  0x4a   :  { %v233_v21 = vadd.f32 %v232_v10, %v231_v14  ;;  %v242_v22 = vmul.f32 %v241_v17, %v446_v0  ;;  %v235_v24 = vstv %s604_s29  ;;  %v246_v29 = vstv %s610_s30 }
  0x4b   :  { %v204_v23 = vadd.f32 %v203_v11, %v193_v15  ;;  %v225_v25 = vmul.f32 %v224_v16, %v223_v20 }
  0x4c   :  { %v234_v26 = vmax.f32 %v233_v21, 0.0  ;;  %v244_v27 = vadd.f32 %v243_v18, %v242_v22 }
  0x4d   :  { %v215_v28 = vadd.f32 %v214_v19, %v204_v23 }
  0x4e   :  { %v236_v30 = vmul.f32 %v235_v24, %v234_v26  ;;  %v245_v31 = vmax.f32 %v244_v27, 0.0 }
  0x4f   :  { %v226_v32 = vadd.f32 %v225_v25, %v215_v28 }
  0x50   :  { %v247_v33 = vmul.f32 %v246_v29, %v245_v31 }
  0x51   :  { %v237_v34 = vadd.f32 %v236_v30, %v226_v32 }
  0x53   :  { %v248_v35 = vadd.f32 %v247_v33, %v237_v34 }
  0x55   :  { %249 = vst [vmem:[#allocation7] sm:$0xff] %v248_v35 }
  0x56   :  { %371 = shalt.err (!%p368_p1)
}
  0x57   :  { %s372_s8 = scalar_lea.hbm %s637_s2, 128 }
  0x58   :  { %p373_p2 = scmp.ne.s32.totalorder %s637_s2, %s372_s8  ;;  %p376_p3 = scmp.lt.u32.totalorder %s372_s8, %s637_s2 }
  0x5a   :  { %p378_p4 = pnand %p376_p3, %p373_p2 }
  0x5c   :  { %381 = shalt.err (!%p378_p4)
}
  0x5d   :  { %259 = dma.vmem_to_hbm [thread:$0]  %s257_s4, 128, %s637_s2, [#allocation6]  }
  0x5e   :  { %386 = dma.done.wait [#allocation6], 128  }
  0x5f   :  { %387 = vsyncadd [#allocation6], 4294967168 }
  0x60   :  { %263 = vsyncpa [#allocation5], 1 }
  0x61   :  { %264 = vsyncpa [#allocation6], 1 }

</bundles_post_ra>
